<compile_context>
chip_gen: v7x
topology: tpu7x:2x2x1
jax: 0.10.0
libtpu: 0.0.40
codegen_flags: <defaults>
</compile_context>

<pallas_src>
import functools

import jax
import jax.numpy as jnp
from jax.experimental import pallas as pl
from jax.experimental.pallas import tpu as pltpu


def _round_up(x: int, m: int) -> int:
    return ((x + m - 1) // m) * m


def _pick_tile(dim: int, cap: int, gran: int) -> int:
    """Largest multiple of `gran` <= cap that divides round_up(dim, gran)."""
    d = _round_up(dim, gran)
    if d <= cap:
        return d
    t = cap - (cap % gran)
    while t >= gran:
        if d % t == 0:
            return t
        t -= gran
    return gran


def _vmem_bytes(tm: int, tn: int, tk: int) -> int:
    # double-buffered x, w, bias input blocks + double-buffered output block (f32)
    return 4 * (2 * (tm * tk + tk * tn + tn) + 2 * tm * tn)


def linear_kernel(x_ref, w_ref, b_ref, o_ref):
    """One (tm, tn) f32 output tile; the output block itself accumulates over k."""
    k = pl.program_id(2)

    @pl.when(k == 0)
    def _():
        o_ref[...] = jnp.zeros_like(o_ref)

    # MXU matmul with f32 accumulation directly into the resident output block.
    o_ref[...] += jnp.dot(x_ref[...], w_ref[...], preferred_element_type=jnp.float32)

    @pl.when(k == pl.num_programs(2) - 1)
    def _():
        o_ref[...] += b_ref[...]  # bias added exactly once per output tile


@functools.partial(jax.jit, static_argnames=("tm", "tn", "tk", "out_f"))
def _linear_pallas(x, w_pad, b_pad, *, tm, tn, tk, out_f):
    B, in_f = x.shape
    K_pad, N_pad = w_pad.shape
    M_pad = _round_up(B, tm)

    # Only the activation is padded per call (weight/bias were padded at setup).
    x_p = jnp.pad(x.astype(jnp.float32), ((0, M_pad - B), (0, K_pad - in_f)))

    grid = (M_pad // tm, N_pad // tn, K_pad // tk)
    vmem_limit = min(max(32 << 20, 2 * _vmem_bytes(tm, tn, tk)), 48 << 20)

    out_p = pl.pallas_call(
        linear_kernel,
        out_shape=jax.ShapeDtypeStruct((M_pad, N_pad), jnp.float32),
        grid_spec=pltpu.PrefetchScalarGridSpec(
            num_scalar_prefetch=0,
            grid=grid,
            in_specs=[
                pl.BlockSpec((tm, tk), lambda i, j, k: (i, k)),  # x tile
                pl.BlockSpec((tk, tn), lambda i, j, k: (k, j)),  # w tile
                pl.BlockSpec((1, tn), lambda i, j, k: (0, j)),   # bias tile
            ],
            out_specs=pl.BlockSpec((tm, tn), lambda i, j, k: (i, j)),
        ),
        compiler_params=pltpu.CompilerParams(
            dimension_semantics=("parallel", "parallel", "arbitrary"),
            vmem_limit_bytes=vmem_limit,
        ),
        cost_estimate=pl.CostEstimate(
            flops=2 * M_pad * K_pad * N_pad,
            transcendentals=0,
            bytes_accessed=4 * (M_pad * K_pad + K_pad * N_pad + M_pad * N_pad),
        ),
    )(x_p, w_pad, b_pad)

    return out_p[:B, :out_f].astype(x.dtype)


class PallasLinear:
    """Pallas-TPU equivalent of nn.Linear(input_size, output_size)."""

    def __init__(self, input_size, output_size, key, dtype=jnp.float32):
        kw, kb = jax.random.split(key)
        bound = 1.0 / (input_size ** 0.5)  # nn.Linear default init range
        w = jax.random.uniform(kw, (input_size, output_size), dtype, -bound, bound)
        b = jax.random.uniform(kb, (output_size,), dtype, -bound, bound)
        self._setup(w, b)

    @classmethod
    def from_params(cls, w, b):
        obj = cls.__new__(cls)
        obj._setup(w, b)
        return obj

    def _setup(self, w, b):
        in_f, out_f = w.shape
        self.in_f, self.out_f = in_f, out_f
        self.w, self.b = w, b

        # Lane-dense padded extents (multiples of 128 on K and N).
        K128 = _round_up(in_f, 128)
        N128 = _round_up(out_f, 128)

        # Generation-aware tiles: big (256-multiple where possible) tiles that
        # divide the padded dims; working set stays far below 64 MiB VMEM (v7x).
        self.tk = _pick_tile(in_f, 1024, 128)
        self.tn = _pick_tile(out_f, 512, 128)
        # Ensure >=2 N blocks when possible so both v7x TensorCores get work.
        if (N128 // self.tn) < 2 and self.tn >= 256 and self.tn % 256 == 0:
            self.tn //= 2

        # Pad weight/bias ONCE (layer constants) — no per-call weight padding.
        self.w_pad = jnp.pad(
            w.astype(jnp.float32), ((0, K128 - in_f), (0, N128 - out_f))
        )
        self.b_pad = jnp.pad(b.astype(jnp.float32), (0, N128 - out_f)).reshape(1, N128)

    def __call__(self, x, *, use_pallas=None):
        B = x.shape[0]
        if use_pallas is None:
            # Bandwidth-bound op: decide on weight bytes, not FLOPs.
            use_pallas = (self.w_pad.size * 4 >= (1 << 20)) or B >= 256
        if not use_pallas:
            return (x @ self.w + self.b).astype(x.dtype)
        # Small-batch: one M tile (weight streams from HBM exactly once).
        tm = _pick_tile(B, 512, 8)
        return _linear_pallas(
            x, self.w_pad, self.b_pad, tm=tm, tn=self.tn, tk=self.tk, out_f=self.out_f
        )


if __name__ == "__main__":
    # --- Shapes implied by the PyTorch module ---
    input_size, output_size, batch = 10, 1, 8

    key = jax.random.PRNGKey(0)
    k_model, k_x = jax.random.split(key)

    model = PallasLinear(input_size, output_size, k_model)
    x = jax.random.normal(k_x, (batch, input_size), jnp.float32)

    # Force the Pallas path (heuristic would pick plain XLA at this toy size).
    out = model(x, use_pallas=True)
    jax.block_until_ready(out)

    ref = x @ model.w + model.b
    assert out.shape == (batch, output_size)
    assert jnp.allclose(out, ref, atol=1e-5, rtol=1e-5)

    # --- Larger shape to exercise the multi-tile grid (2 K steps, 2 N tiles) ---
    k2 = jax.random.PRNGKey(1)
    kw2, kb2, kx2 = jax.random.split(k2, 3)
    in2, out2, b2 = 1024, 256, 96
    w2 = jax.random.normal(kw2, (in2, out2), jnp.float32) * 0.02
    bb2 = jax.random.normal(kb2, (out2,), jnp.float32) * 0.02
    x2 = jax.random.normal(kx2, (b2, in2), jnp.float32)

    lin2 = PallasLinear.from_params(w2, bb2)
    out_big = lin2(x2, use_pallas=True)
    jax.block_until_ready(out_big)

    ref_big = jnp.dot(x2, w2, precision=jax.lax.Precision.HIGHEST) + bb2
    assert out_big.shape == (b2, out2)
    assert jnp.allclose(out_big, ref_big, atol=1e-2, rtol=1e-2)

    print("KERNEL_OK")
</pallas_src>

<mosaic_0001>
module attributes {stable_mosaic.version = 11 : i64} {
  func.func @linear_kernel(%arg0: i32, %arg1: i32, %arg2: i32, %arg3: memref<8x128xf32, #tpu.memory_space<vmem>>, %arg4: memref<128x128xf32, #tpu.memory_space<vmem>>, %arg5: memref<1x128xf32, #tpu.memory_space<vmem>>, %arg6: memref<8x128xf32, #tpu.memory_space<vmem>>) attributes {dimension_semantics = [#tpu.dimension_semantics<parallel>, #tpu.dimension_semantics<parallel>, #tpu.dimension_semantics<arbitrary>], iteration_bounds = array<i64: 1, 1, 1>, scalar_prefetch = 0 : i64, scratch_operands = 0 : i64, tpu.core_type = #tpu.core_type<tc>, window_params = [{transform_indices = @transform_0, window_bounds = array<i64: 8, 128>}, {transform_indices = @transform_1, window_bounds = array<i64: 128, 128>}, {transform_indices = @transform_2, window_bounds = array<i64: 1, 128>}, {transform_indices = @transform_3, window_bounds = array<i64: 8, 128>}]} {
    %c0_i32 = arith.constant 0 : i32
    %0 = arith.cmpi eq, %arg2, %c0_i32 : i32
    %1 = arith.extui %0 : i1 to i32
    %c0_i32_0 = arith.constant 0 : i32
    %2 = arith.cmpi ne, %1, %c0_i32_0 : i32
    scf.if %2 {
      %cst_10 = arith.constant 0.000000e+00 : f32
      %12 = vector.broadcast %cst_10 : f32 to vector<8x128xf32>
      %c0_11 = arith.constant 0 : index
      %c0_12 = arith.constant 0 : index
      %13 = vector.load %arg6[%c0_11, %c0_12] : memref<8x128xf32, #tpu.memory_space<vmem>>, vector<8x128xf32>
      tpu.vector_store %arg6[%c0_11, %c0_12], %12 {strides = array<i32>} : memref<8x128xf32, #tpu.memory_space<vmem>>, vector<8x128xf32>,
    } else {
    }
    %c0 = arith.constant 0 : index
    %c0_1 = arith.constant 0 : index
    %3 = vector.load %arg6[%c0, %c0_1] : memref<8x128xf32, #tpu.memory_space<vmem>>, vector<8x128xf32>
    %c0_2 = arith.constant 0 : index
    %c0_3 = arith.constant 0 : index
    %4 = vector.load %arg3[%c0_2, %c0_3] : memref<8x128xf32, #tpu.memory_space<vmem>>, vector<8x128xf32>
    %c0_4 = arith.constant 0 : index
    %c0_5 = arith.constant 0 : index
    %5 = vector.load %arg4[%c0_4, %c0_5] : memref<128x128xf32, #tpu.memory_space<vmem>>, vector<128x128xf32>
    %cst = arith.constant dense<0.000000e+00> : vector<8x128xf32>
    %6 = tpu.matmul %4, %5, %cst {dimension_numbers = #tpu.dot_dimension_numbers<[1], [0], [0], [1], [0, 0, 1, 1], [], []>} : vector<8x128xf32>, vector<128x128xf32>, vector<8x128xf32> -> vector<8x128xf32>
    %7 = arith.addf %3, %6 : vector<8x128xf32>
    %c0_6 = arith.constant 0 : index
    %c0_7 = arith.constant 0 : index
    %8 = vector.load %arg6[%c0_6, %c0_7] : memref<8x128xf32, #tpu.memory_space<vmem>>, vector<8x128xf32>
    tpu.vector_store %arg6[%c0_6, %c0_7], %7 {strides = array<i32>} : memref<8x128xf32, #tpu.memory_space<vmem>>, vector<8x128xf32>,
    %c0_i32_8 = arith.constant 0 : i32
    %9 = arith.cmpi eq, %arg2, %c0_i32_8 : i32
    %10 = arith.extui %9 : i1 to i32
    %c0_i32_9 = arith.constant 0 : i32
    %11 = arith.cmpi ne, %10, %c0_i32_9 : i32
    scf.if %11 {
      %c0_10 = arith.constant 0 : index
      %c0_11 = arith.constant 0 : index
      %12 = vector.load %arg6[%c0_10, %c0_11] : memref<8x128xf32, #tpu.memory_space<vmem>>, vector<8x128xf32>
      %c0_12 = arith.constant 0 : index
      %c0_13 = arith.constant 0 : index
      %13 = vector.load %arg5[%c0_12, %c0_13] : memref<1x128xf32, #tpu.memory_space<vmem>>, vector<1x128xf32>
      %14 = vector.broadcast %13 : vector<1x128xf32> to vector<8x128xf32>
      %15 = arith.addf %12, %14 : vector<8x128xf32>
      %c0_14 = arith.constant 0 : index
      %c0_15 = arith.constant 0 : index
      %16 = vector.load %arg6[%c0_14, %c0_15] : memref<8x128xf32, #tpu.memory_space<vmem>>, vector<8x128xf32>
      tpu.vector_store %arg6[%c0_14, %c0_15], %15 {strides = array<i32>} : memref<8x128xf32, #tpu.memory_space<vmem>>, vector<8x128xf32>,
    } else {
    }
    return
  }
  func.func @transform_0(%arg0: i32, %arg1: i32, %arg2: i32) -> (i32, i32) {
    %c0_i32 = arith.constant 0 : i32
    return %arg0, %arg2 : i32, i32
  }
  func.func @transform_1(%arg0: i32, %arg1: i32, %arg2: i32) -> (i32, i32) {
    %c0_i32 = arith.constant 0 : i32
    return %arg2, %arg1 : i32, i32
  }
  func.func @transform_2(%arg0: i32, %arg1: i32, %arg2: i32) -> (i32, i32) {
    %c0_i32 = arith.constant 0 : i32
    %c0_i32_0 = arith.constant 0 : i32
    return %c0_i32, %arg1 : i32, i32
  }
  func.func @transform_3(%arg0: i32, %arg1: i32, %arg2: i32) -> (i32, i32) {
    %c0_i32 = arith.constant 0 : i32
    return %arg0, %arg1 : i32, i32
  }
}

</mosaic_0001>

<bundles_post_ra>
// kernel: _linear_pallas.1
= control target key start
LH: loop header
LB: loop body
LE: loop exit
PB: predicated region body
PF: predicated region fallthrough
CT: control target
= control target key end

     0   :  { %8 = vsyncpa [#allocation3], 0  ;;  %s248_s12 = smov [#allocation2]   ;;  %s295_s0 = inlined_call_operand.vmem [shape: f32[8,128], index: 0, kind: input, shape index: {}]   ;;  %s296_s1 = inlined_call_operand.hbm [shape: f32[128,128], index: 1, kind: input, shape index: {}]   ;;  %s297_s2 = inlined_call_operand.vmem [shape: f32[1,128], index: 2, kind: input, shape index: {}]   ;;  %s298_s3 = inlined_call_operand.vmem [shape: f32[8,128], index: 3, kind: output, shape index: {}]  }
   0x1   :  { %s16_s13 = sshll.u32 %s248_s12, 4  ;;  %s224_s16 = scalar_lea.hbm %s296_s1, 2048  ;;  %s17_s13 = int_to_ptr.vmem [resolvable:$true] %s16_s13 }
   0x2   :  { %p225_p0 = scmp.ne.s32.totalorder %s296_s1, %s224_s16  ;;  %p228_p1 = scmp.lt.u32.totalorder %s224_s16, %s296_s1 }
   0x4   :  { %p230_p2 = pnand %p228_p1, %p225_p0 }
   0x6   :  { %233 = shalt.err (!%p230_p2)
}
   0x7   :  { %s234_s21 = scalar_lea.vmem %s17_s13, 2048  ;;  %p239_p4 = scmp.lt.s32.totalorder %s17_s13, %s17_s13 }
   0x8   :  { %p235_p3 = scmp.ne.s32.totalorder %s17_s13, %s234_s21  ;;  %p240_p5 = scmp.lt.s32.totalorder %s234_s21, %s234_s21 }
   0xa   :  { %p241_p6 = por %p240_p5, %p239_p4 }
   0xc   :  { %p242_p7 = pnand %p241_p6, %p235_p3 }
   0xe   :  { %245 = shalt.err (!%p242_p7)
}
   0xf   :  { %s249_s22 = smov 128   ;;  %s250_s23 = smov 8  }
  0x10   :  { %22 = dma.hbm_to_vmem [thread:$0]  %s296_s1, 2048, %s17_s13, [#allocation3], %s249_s22, %s249_s22, %s250_s23  }
  0x11   :  { %246 = dma.done.wait [#allocation3], 2048  }
  0x12   :  { %247 = vsyncadd [#allocation3], 4294965248  ;;  %v251_v0 = vmov 0.0|0.0   ;;  %vm252_vm0 = vmmov 0   ;;  %v253_v1 = vmov 0.0   ;;  %v35_v2 = vld [vmem:[#allocation2] sm:$0xff] }
  0x13   :  { %194 = vmatprep.subr.bf16.mxu0 %v251_v0  ;;  %191 = vmatprep.mubr.msk.f32.mxu0 %vm252_vm0, %v253_v1  ;;  %v36_v3 = vld [vmem:[#allocation2 + $0x8] sm:$0xff]  ;;  %v37_v4 = vld [vmem:[#allocation2 + $0x10] sm:$0xff]  ;;  %v38_v6 = vld [vmem:[#allocation2 + $0x18] sm:$0xff] }
  0x14   :  { %v195_v5 = vpack.c.bf16 %v36_v3, %v35_v2  ;;  %v198_v7 = vpack.c.bf16 %v38_v6, %v37_v4  ;;  %v39_v8 = vld [vmem:[#allocation2 + $0x20] sm:$0xff]  ;;  %v40_v9 = vld [vmem:[#allocation2 + $0x28] sm:$0xff]  ;;  %v41_v11 = vld [vmem:[#allocation2 + $0x30] sm:$0xff] }
  0x15   :  { %v201_v10 = vpack.c.bf16 %v40_v9, %v39_v8  ;;  %v42_v12 = vld [vmem:[#allocation2 + $0x38] sm:$0xff]  ;;  %v43_v14 = vld [vmem:[#allocation2 + $0x40] sm:$0xff]  ;;  %v44_v15 = vld [vmem:[#allocation2 + $0x48] sm:$0xff] }
  0x16   :  { %196 = vmatpush3.bf16.msra.mxu0 %v195_v5  ;;  %v204_v13 = vpack.c.bf16 %v42_v12, %v41_v11  ;;  %v207_v16 = vpack.c.bf16 %v44_v15, %v43_v14  ;;  %v45_v17 = vld [vmem:[#allocation2 + $0x50] sm:$0xff]  ;;  %v46_v18 = vld [vmem:[#allocation2 + $0x58] sm:$0xff]  ;;  %v47_v20 = vld [vmem:[#allocation2 + $0x60] sm:$0xff] }
  0x17   :  { %197 = vmatprep.subr.bf16.mxu0 %v251_v0  ;;  %v210_v19 = vpack.c.bf16 %v46_v18, %v45_v17  ;;  %v48_v21 = vld [vmem:[#allocation2 + $0x68] sm:$0xff]  ;;  %v49_v23 = vld [vmem:[#allocation2 + $0x70] sm:$0xff]  ;;  %v50_v24 = vld [vmem:[#allocation2 + $0x78] sm:$0xff] }
  0x18   :  { %v213_v22 = vpack.c.bf16 %v48_v21, %v47_v20  ;;  %v216_v25 = vpack.c.bf16 %v50_v24, %v49_v23  ;;  %v34_v26 = vld [vmem:[%s295_s0] sm:$0xff] }
  0x19   :  { %v141_v28 = vld [vmem:[%s297_s2] ss:$0 sm:$0xff] }
  0x1a   :  { %199 = vmatpush3.bf16.msra.mxu0 %v198_v7 }
  0x1b   :  { %200 = vmatprep.subr.bf16.mxu0 %v251_v0 }
  0x1e   :  { %202 = vmatpush3.bf16.msra.mxu0 %v201_v10 }
  0x1f   :  { %203 = vmatprep.subr.bf16.mxu0 %v251_v0 }
  0x22   :  { %205 = vmatpush3.bf16.msra.mxu0 %v204_v13 }
  0x23   :  { %206 = vmatprep.subr.bf16.mxu0 %v251_v0 }
  0x26   :  { %208 = vmatpush3.bf16.msra.mxu0 %v207_v16 }
  0x27   :  { %209 = vmatprep.subr.bf16.mxu0 %v251_v0 }
  0x2a   :  { %211 = vmatpush3.bf16.msra.mxu0 %v210_v19 }
  0x2b   :  { %212 = vmatprep.subr.bf16.mxu0 %v251_v0 }
  0x2e   :  { %214 = vmatpush3.bf16.msra.mxu0 %v213_v22 }
  0x2f   :  { %215 = vmatprep.subr.bf16.mxu0 %v251_v0 }
  0x32   :  { %217 = vmatpush3.bf16.msra.mxu0 %v216_v25 }
  0x35   :  { %192 = vmatmul.mubr.f32.vlgmr.msra.gmra.mrb[0].mxu0 %v34_v26 }
 0x108   :  { %v117_v27 = vpop.f32.mrb[0].mxu0 }
 0x109   :  { %v193_v29 = vpop.f32.mrb[1].mxu0  ;;  %v134_v30 = vadd.f32 %v141_v28, %v117_v27 }
 0x10b   :  { %135 = vst [vmem:[%s298_s3] sm:$0xff] %v134_v30 }
 0x10c   :  { %140 = vsyncpa [#allocation3], 1 }

</bundles_post_ra>
